<compile_context>
chip_gen: v7x
topology: tpu7x:2x2x1
jax: 0.10.0
libtpu: 0.0.40
codegen_flags: <defaults>
</compile_context>

<pallas_src>
import jax
import jax.numpy as jnp
from jax.experimental import pallas as pl
from jax.experimental.pallas import tpu as pltpu

LATENT_DIM = 512
MAPPING_NET_DEPTH = 8
NEG_SLOPE = 0.2


# ----------------------------- kernels --------------------------------------


def _depth_pipelined_kernel(z_ref, w_ref, b_ref, o_ref, x_scr):
    """grid=(DEPTH,): one layer per grid step; activation carried in VMEM scratch.

    z_ref: (B, D) f32   w_ref: (1, D, D) bf16   b_ref: (1, 1, D) f32
    o_ref: (B, D)       x_scr: (B, D) f32
    """
    l = pl.program_id(0)

    @pl.when(l == 0)
    def _init():
        x_scr[...] = z_ref[...].astype(jnp.float32)

    y = jnp.dot(x_scr[...].astype(jnp.bfloat16), w_ref[0],
                preferred_element_type=jnp.float32) + b_ref[0]
    x_scr[...] = jnp.maximum(y, NEG_SLOPE * y)          # LeakyReLU(0.2)

    @pl.when(l == pl.num_programs(0) - 1)
    def _finalize():
        o_ref[...] = x_scr[...].astype(o_ref.dtype)


def _resident_weights_kernel(z_ref, w_ref, b_ref, o_ref):
    """grid=(num_batch_tiles,): whole weight stack resident, layers unrolled.

    z_ref: (TB, D) f32   w_ref: (DEPTH, D, D) bf16   b_ref: (DEPTH, 1, D) f32
    """
    x = z_ref[...].astype(jnp.float32)
    for l in range(MAPPING_NET_DEPTH):                  # static unroll: 8 MXU matmuls
        y = jnp.dot(x.astype(jnp.bfloat16), w_ref[l],
                    preferred_element_type=jnp.float32) + b_ref[l]
        x = jnp.maximum(y, NEG_SLOPE * y)               # LeakyReLU(0.2)
    o_ref[...] = x.astype(o_ref.dtype)


# ----------------------------- wrappers --------------------------------------


def _mapping_depth_pipelined(z, w_bf16, b_eff):
    """Single batch tile: stream weights layer-by-layer (DMA hidden under compute)."""
    B, D = z.shape
    return pl.pallas_call(
        _depth_pipelined_kernel,
        out_shape=jax.ShapeDtypeStruct((B, D), z.dtype),
        grid_spec=pltpu.PrefetchScalarGridSpec(
            num_scalar_prefetch=0,
            grid=(MAPPING_NET_DEPTH,),
            in_specs=[
                pl.BlockSpec((B, D), lambda l: (0, 0)),
                pl.BlockSpec((1, D, D), lambda l: (l, 0, 0)),
                pl.BlockSpec((1, 1, D), lambda l: (l, 0, 0)),
            ],
            out_specs=pl.BlockSpec((B, D), lambda l: (0, 0)),
            scratch_shapes=[pltpu.VMEM((B, D), jnp.float32)],
        ),
        compiler_params=pltpu.CompilerParams(
            dimension_semantics=("arbitrary",),   # depth is a carried reduction axis
            vmem_limit_bytes=32 << 20,
        ),
    )(z, w_bf16, b_eff)


def _mapping_batch_tiled(z, w_bf16, b_eff, tile_b):
    """Large batch: weights resident in VMEM, grid over batch tiles."""
    B, D = z.shape
    num_tiles = B // tile_b
    return pl.pallas_call(
        _resident_weights_kernel,
        out_shape=jax.ShapeDtypeStruct((B, D), z.dtype),
        grid_spec=pltpu.PrefetchScalarGridSpec(
            num_scalar_prefetch=0,
            grid=(num_tiles,),
            in_specs=[
                pl.BlockSpec((tile_b, D), lambda i: (i, 0)),
                pl.BlockSpec((MAPPING_NET_DEPTH, D, D), lambda i: (0, 0, 0)),
                pl.BlockSpec((MAPPING_NET_DEPTH, 1, D), lambda i: (0, 0, 0)),
            ],
            out_specs=pl.BlockSpec((tile_b, D), lambda i: (i, 0)),
        ),
        compiler_params=pltpu.CompilerParams(
            dimension_semantics=("parallel",),
            # Explicit budget: fits v7x's 64 MiB per-TC VMEM even with the
            # double-buffered 4 MiB bf16 weight stack per core; headroom on
            # v5e/v6e's 128 MiB.
            vmem_limit_bytes=48 << 20,
        ),
    )(z, w_bf16, b_eff)


def mapping_network(z, w_bf16, b_eff):
    B, D = z.shape
    assert D == LATENT_DIM
    # Pick the largest batch tile in {1024, 512, 256} that divides B with >= 2
    # tiles, preferring an EVEN tile count (v7x shards the parallel axis over
    # two TensorCores).  Otherwise: single tile -> depth-pipelined path.
    tile_b = None
    for t in (1024, 512, 256):
        if B % t == 0 and B // t >= 2:
            if tile_b is None:
                tile_b = t
            if (B // t) % 2 == 0:
                tile_b = t
                break
    if tile_b is None:
        # TODO(synk): very large B that is not a multiple of 256 would need a
        # padded batch-tiled path; out of scope for this module's usage.
        return _mapping_depth_pipelined(z, w_bf16, b_eff)
    return _mapping_batch_tiled(z, w_bf16, b_eff, tile_b)


# -------------------------- params / reference -------------------------------


def init_params(key):
    """Matches MappingNetwork.__init__/forward semantics:
    weight = randn([out,in]) / lr, used as weight * (lr*sqrt(2)/sqrt(in));
    bias = bias_init * lr.  Weights pre-scaled, pre-transposed to (in, out) and
    cast to bf16 for the kernel (glue, not kernel work)."""
    lr_multiplier = 0.01
    bias_init = 0.0
    weight_gain = lr_multiplier * ((2.0 ** 0.5) / (float(LATENT_DIM) ** 0.5))
    bias_gain = lr_multiplier

    keys = jax.random.split(key, MAPPING_NET_DEPTH)
    weights = jnp.stack(
        [jax.random.normal(k, (LATENT_DIM, LATENT_DIM), jnp.float32) / lr_multiplier
         for k in keys]
    )                                                       # (DEPTH, out, in)
    biases = jnp.full((MAPPING_NET_DEPTH, LATENT_DIM), bias_init, jnp.float32)

    w_eff = jnp.transpose(weights * weight_gain, (0, 2, 1))  # (DEPTH, in, out)
    b_eff = (biases * bias_gain).reshape(MAPPING_NET_DEPTH, 1, LATENT_DIM)
    return w_eff.astype(jnp.bfloat16), b_eff


def reference_forward(z, w_bf16, b_eff):
    """Pure-JAX reference with the SAME numerics as the kernels: bf16 operands,
    f32 accumulation, max-based LeakyReLU (mirrors the module forward up to the
    deliberate bf16 weight/LHS quantization used in the kernels)."""
    x = z.astype(jnp.float32)
    for l in range(MAPPING_NET_DEPTH):
        y = jnp.dot(x.astype(jnp.bfloat16), w_bf16[l],
                    preferred_element_type=jnp.float32) + b_eff[l]
        x = jnp.maximum(y, NEG_SLOPE * y)
    return x


# ------------------------------- demo ----------------------------------------


if __name__ == "__main__":
    key = jax.random.PRNGKey(0)
    k_param, k_z1, k_z2 = jax.random.split(key, 3)

    w_bf16, b_eff = init_params(k_param)

    # Small batch -> depth-pipelined path (grid over the 8 layers).
    z_small = jax.random.normal(k_z1, (16, LATENT_DIM), jnp.float32)
    out_s = jax.block_until_ready(mapping_network(z_small, w_bf16, b_eff))
    ref_s = jax.block_until_ready(reference_forward(z_small, w_bf16, b_eff))
    assert out_s.shape == z_small.shape
    assert bool(jnp.all(jnp.isfinite(out_s)))
    assert bool(jnp.allclose(out_s, ref_s, rtol=2e-2, atol=2e-2))

    # Larger batch -> batch-tiled resident-weight path (2 tiles of 256 rows).
    z_large = jax.random.normal(k_z2, (512, LATENT_DIM), jnp.float32)
    out_l = jax.block_until_ready(mapping_network(z_large, w_bf16, b_eff))
    ref_l = jax.block_until_ready(reference_forward(z_large, w_bf16, b_eff))
    assert out_l.shape == z_large.shape
    assert bool(jnp.all(jnp.isfinite(out_l)))
    assert bool(jnp.allclose(out_l, ref_l, rtol=2e-2, atol=2e-2))

    print("KERNEL_OK")
</pallas_src>

<mosaic_0001>
module attributes {stable_mosaic.version = 11 : i64} {
  func.func @_depth_pipelined_kernel(%arg0: i32, %arg1: memref<16x512xf32, #tpu.memory_space<vmem>>, %arg2: memref<1x512x512xbf16, #tpu.memory_space<vmem>>, %arg3: memref<1x1x512xf32, #tpu.memory_space<vmem>>, %arg4: memref<16x512xf32, #tpu.memory_space<vmem>>, %arg5: memref<16x512xf32, #tpu.memory_space<vmem>>) attributes {dimension_semantics = [#tpu.dimension_semantics<arbitrary>], iteration_bounds = array<i64: 8>, scalar_prefetch = 0 : i64, scratch_operands = 1 : i64, tpu.core_type = #tpu.core_type<tc>, window_params = [{pipeline_mode = #tpu.pipeline_mode<synchronous>, transform_indices = @transform_0, window_bounds = array<i64: 16, 512>}, {transform_indices = @transform_1, window_bounds = array<i64: 1, 512, 512>}, {transform_indices = @transform_2, window_bounds = array<i64: 1, 1, 512>}, {pipeline_mode = #tpu.pipeline_mode<synchronous>, transform_indices = @transform_3, window_bounds = array<i64: 16, 512>}]} {
    %c0_i32 = arith.constant 0 : i32
    %0 = arith.cmpi eq, %arg0, %c0_i32 : i32
    %1 = arith.extui %0 : i1 to i32
    %c0_i32_0 = arith.constant 0 : i32
    %2 = arith.cmpi ne, %1, %c0_i32_0 : i32
    scf.if %2 {
      %c0_12 = arith.constant 0 : index
      %c0_13 = arith.constant 0 : index
      %19 = vector.load %arg1[%c0_12, %c0_13] : memref<16x512xf32, #tpu.memory_space<vmem>>, vector<16x512xf32>
      %c0_14 = arith.constant 0 : index
      %c0_15 = arith.constant 0 : index
      %20 = vector.load %arg5[%c0_14, %c0_15] : memref<16x512xf32, #tpu.memory_space<vmem>>, vector<16x512xf32>
      tpu.vector_store %arg5[%c0_14, %c0_15], %19 {strides = array<i32>} : memref<16x512xf32, #tpu.memory_space<vmem>>, vector<16x512xf32>,
    } else {
    }
    %c0 = arith.constant 0 : index
    %c0_1 = arith.constant 0 : index
    %3 = vector.load %arg5[%c0, %c0_1] : memref<16x512xf32, #tpu.memory_space<vmem>>, vector<16x512xf32>
    %4 = arith.truncf %3 : vector<16x512xf32> to vector<16x512xbf16>
    %c0_2 = arith.constant 0 : index
    %c0_3 = arith.constant 0 : index
    %c0_4 = arith.constant 0 : index
    %5 = vector.load %arg2[%c0_2, %c0_3, %c0_4] : memref<1x512x512xbf16, #tpu.memory_space<vmem>>, vector<1x512x512xbf16>
    %6 = vector.shape_cast %5 : vector<1x512x512xbf16> to vector<512x512xbf16>
    %cst = arith.constant dense<0.000000e+00> : vector<16x512xf32>
    %7 = tpu.matmul %4, %6, %cst {dimension_numbers = #tpu.dot_dimension_numbers<[1], [0], [0], [1], [0, 0, 1, 1], [], []>} : vector<16x512xbf16>, vector<512x512xbf16>, vector<16x512xf32> -> vector<16x512xf32>
    %c0_5 = arith.constant 0 : index
    %c0_6 = arith.constant 0 : index
    %c0_7 = arith.constant 0 : index
    %8 = vector.load %arg3[%c0_5, %c0_6, %c0_7] : memref<1x1x512xf32, #tpu.memory_space<vmem>>, vector<1x1x512xf32>
    %9 = vector.shape_cast %8 : vector<1x1x512xf32> to vector<1x512xf32>
    %10 = vector.broadcast %9 : vector<1x512xf32> to vector<16x512xf32>
    %11 = arith.addf %7, %10 : vector<16x512xf32>
    %cst_8 = arith.constant 2.000000e-01 : f32
    %12 = vector.broadcast %cst_8 : f32 to vector<16x512xf32>
    %13 = arith.mulf %12, %11 : vector<16x512xf32>
    %14 = arith.maximumf %11, %13 : vector<16x512xf32>
    %c0_9 = arith.constant 0 : index
    %c0_10 = arith.constant 0 : index
    %15 = vector.load %arg5[%c0_9, %c0_10] : memref<16x512xf32, #tpu.memory_space<vmem>>, vector<16x512xf32>
    tpu.vector_store %arg5[%c0_9, %c0_10], %14 {strides = array<i32>} : memref<16x512xf32, #tpu.memory_space<vmem>>, vector<16x512xf32>,
    %c7_i32 = arith.constant 7 : i32
    %16 = arith.cmpi eq, %arg0, %c7_i32 : i32
    %17 = arith.extui %16 : i1 to i32
    %c0_i32_11 = arith.constant 0 : i32
    %18 = arith.cmpi ne, %17, %c0_i32_11 : i32
    scf.if %18 {
      %c0_12 = arith.constant 0 : index
      %c0_13 = arith.constant 0 : index
      %19 = vector.load %arg5[%c0_12, %c0_13] : memref<16x512xf32, #tpu.memory_space<vmem>>, vector<16x512xf32>
      %c0_14 = arith.constant 0 : index
      %c0_15 = arith.constant 0 : index
      %20 = vector.load %arg4[%c0_14, %c0_15] : memref<16x512xf32, #tpu.memory_space<vmem>>, vector<16x512xf32>
      tpu.vector_store %arg4[%c0_14, %c0_15], %19 {strides = array<i32>} : memref<16x512xf32, #tpu.memory_space<vmem>>, vector<16x512xf32>,
    } else {
    }
    return
  }
  func.func @transform_0(%arg0: i32) -> (i32, i32) {
    %c0_i32 = arith.constant 0 : i32
    %c0_i32_0 = arith.constant 0 : i32
    %c0_i32_1 = arith.constant 0 : i32
    return %c0_i32, %c0_i32_0 : i32, i32
  }
  func.func @transform_1(%arg0: i32) -> (i32, i32, i32) {
    %c0_i32 = arith.constant 0 : i32
    %c0_i32_0 = arith.constant 0 : i32
    %c0_i32_1 = arith.constant 0 : i32
    return %arg0, %c0_i32, %c0_i32_0 : i32, i32, i32
  }
  func.func @transform_2(%arg0: i32) -> (i32, i32, i32) {
    %c0_i32 = arith.constant 0 : i32
    %c0_i32_0 = arith.constant 0 : i32
    %c0_i32_1 = arith.constant 0 : i32
    return %arg0, %c0_i32, %c0_i32_0 : i32, i32, i32
  }
  func.func @transform_3(%arg0: i32) -> (i32, i32) {
    %c0_i32 = arith.constant 0 : i32
    %c0_i32_0 = arith.constant 0 : i32
    %c0_i32_1 = arith.constant 0 : i32
    return %c0_i32, %c0_i32_0 : i32, i32
  }
}

</mosaic_0001>

<bundles_post_ra>
// kernel: tpu_custom_call.1
= control target key start
LH: loop header
LB: loop body
LE: loop exit
PB: predicated region body
PF: predicated region fallthrough
CT: control target
= control target key end

     0   :  { %8 = vsyncpa [#allocation4], 0  ;;  %s2317_s0 = inlined_call_operand.hbm [shape: f32[16,512], index: 0, kind: input, shape index: {}]   ;;  %s2318_s1 = inlined_call_operand.hbm [shape: bf16[8,512,512], index: 1, kind: input, shape index: {}]   ;;  %s2319_s2 = inlined_call_operand.hbm [shape: f32[8,1,512], index: 2, kind: input, shape index: {}]   ;;  %s2320_s3 = inlined_call_operand.hbm [shape: f32[16,512], index: 3, kind: output, shape index: {}]  }
   0x1   :  { %9 = vsyncpa [#allocation7], 0 }
   0x2   :  { %11 = vsyncpa [#allocation7 + $0x1], 0 }
   0x3   :  { %12 = vsyncpa [#allocation5], 0  ;;  %s1970_s12 = smov 0   ;;  %s1972_s13 = smov 0  }
   0x4   :  { %s1974_s14 = smov 0   ;;  %s1976_s15 = smov 0  }
   0x5 LB: > { %s1991_s16 = sadd.s32 1, %s1938_s15   ;;  %s46_s17 = sadd.s32 1, %s1934_s14  ;;  %s1938_s15 = sphi %s1976_s15, %s2342_s15   ;;  %s1934_s14 = sphi %s1974_s14, %s2341_s14   ;;  %s1930_s13 = sphi %s1972_s13, %s2340_s13   ;;  %s1926_s12 = sphi %s1970_s12, %s2339_s12  }
   0x6   : > { %s43_s18 = ssub.s32 %s1938_s15, %s1991_s16  ;;  %p53_p0 = scmp.ne.s32.totalorder %s1934_s14, %s1930_s13 }
   0x7   : > { %p44_p1 = scmp.eq.s32.totalorder %s43_s18, 0  ;;  %p54_p2 = scmp.eq.s32.totalorder %s1938_s15, 0 }
   0x8   : > { %p1546_p3 = scmp.lt.s32.totalorder %s1938_s15, 8  ;;  %s143_s20 = sand.u32 1, %s1938_s15  }
   0x9   : > { %s2001_s19 = scalar_select %p44_p1, %s1934_s14, %s46_s17  }
   0xa   : > { %p55_p4 = por %p54_p2, %p53_p0  ;;  %s145_s21 = sand.u32 1, %s1934_s14  }
   0xb   : > { %s1360_s22 = sshll.u32 %s145_s21, 10  ;;  %s1504_s23 = sshll.u32 %s1938_s15, 14 }
   0xc   : > { %s2011_s26 = scalar_lea.hbm %s2318_s1, %s1504_s23  ;;  %s147_s27 = scalar_lea.vmem [#allocation6], %s1360_s22 }
   0xd   : > { %s154_s28 = sshll.u32 %s147_s27, 4  ;;  %p2013_p5 = pnand %p1546_p3, %p55_p4  ;;  %s2017_s28 = int_to_ptr.vmem [resolvable:$true] %s154_s28 }
   0xe   : > { %s2019_s30 = scalar_lea.sflag [#allocation7], %s143_s20  ;;  %s1782_s4 = scalar_lea.hbm %s2011_s26, 16384 }
   0xf   : > { %s2327_s29 = scalar_select %p2013_p5, 1, 0 }
  0x10   : > { %p1783_p6 = scmp.ne.s32.totalorder %s2011_s26, %s1782_s4  ;;  %p2322_p7 = pneg %p2013_p5 }
  0x11   : > { %s1787_s7 = scalar_lea.hbm %s2318_s1, 131072  ;;  %p1788_p10 = scmp.lt.u32.totalorder %s2011_s26, %s2318_s1 }
  0x12   : > { %p1785_p8 = pnand %p2322_p7, %p1783_p6  ;;  %p1789_p11 = scmp.lt.u32.totalorder %s1787_s7, %s1782_s4 }
  0x13   : > { %p1791_p13 = scmp.lt.u32.totalorder %s1782_s4, %s2011_s26 }
  0x14   : > { %p1786_p9 = pneg %p1785_p8  ;;  %p1790_p12 = por %p1789_p11, %p1788_p10 }
  0x16   : > { %p1792_p0 = por %p1791_p13, %p1790_p12 }
  0x18   : > { %p1793_p1 = pnand %p1792_p0, %p1786_p9 }
  0x1a   : > { %1796 = shalt.err (!%p1793_p1)
}
  0x1b   : > { %s1797_s10 = scalar_lea.vmem %s2017_s28, 16384  ;;  %s1940_s11 = smov [#allocation6]  }
  0x1c   : > { %p1798_p2 = scmp.ne.s32.totalorder %s2017_s28, %s1797_s10  ;;  %s1802_s17 = sshll.u32 %s1940_s11, 4  ;;  %s1803_s17 = int_to_ptr.vmem [resolvable:$false] %s1802_s17 }
  0x1d   : > { %s1804_s18 = scalar_lea.vmem %s1803_s17, 32768  ;;  %p1805_p6 = scmp.lt.s32.totalorder %s2017_s28, %s1803_s17 }
  0x1e   : > { %p1800_p3 = pnand %p1798_p2, %p2322_p7  ;;  %p1806_p8 = scmp.lt.s32.totalorder %s1804_s18, %s1797_s10 }
  0x20   : > { %p1801_p4 = pneg %p1800_p3  ;;  %p1807_p10 = por %p1806_p8, %p1805_p6 }
  0x22   : > { %p1808_p11 = pnand %p1807_p10, %p1801_p4 }
  0x24   : > { %1811 = shalt.err (!%p1808_p11)
}
  0x25   : > { %s1941_s20 = smov 256   ;;  %s1942_s22 = smov 16  }
  0x26   : > { %1541 = dma.hbm_to_vmem [thread:$0]  (!%p2013_p5), %s2011_s26, 16384, %s2017_s28, %s2019_s30, %s1941_s20, %s1941_s20, %s1942_s22  }
  0x27   : > { %s2048_s23 = sadd.s32 4294967295, %s1938_s15   ;;  %p59_p12 = scmp.ne.s32.totalorder %s1930_s13, %s1926_s12 }
  0x28   : > { %p2321_p9 = scmp.eq.s32.totalorder %s2048_s23, 0  ;;  %p1357_p13 = scmp.ge.s32.totalorder %s1938_s15, 1 }
  0x29   : > { %p117_p0 = scmp.lt.s32.totalorder %s1938_s15, 9  ;;  %s1943_s26 = smov [#allocation3]  }
  0x2a   : > { %p2058_p2 = por %p2321_p9, %p59_p12  ;;  %s129_s27 = sshll.u32 %s1943_s26, 4  ;;  %s2066_s27 = int_to_ptr.vmem [resolvable:$true] %s129_s27 }
  0x2b   : > { %p2062_p3 = pnand %p1357_p13, %p117_p0  ;;  %s1363_s12 = sshll.u32 %s145_s21, 2 }
  0x2c   : > { %s2328_s24 = scalar_select %p2058_p2, 1, 0 }
  0x2d   : > { %s2329_s25 = scalar_select %p2062_p3, 1, 0 }
  0x2e   : > { %p1534_p4 = pneg %p2062_p3  ;;  %s1505_s28 = sshll.u32 %s1938_s15, 6 }
  0x2f   : > { %s2082_s7 = scalar_lea.hbm %s2319_s2, %s1505_s28  ;;  %s168_s8 = scalar_lea.vmem [#allocation8], %s1363_s12 }
  0x30   : > { %p2075_p6 = pnand %p1534_p4, %p2321_p9  ;;  %s176_s9 = sshll.u32 %s168_s8, 4  ;;  %s2084_s9 = int_to_ptr.vmem [resolvable:$true] %s176_s9 }
  0x31   : > { %s1812_s21 = scalar_lea.hbm %s2317_s0, 1024 }
  0x32   : > { %p1813_p8 = scmp.ne.s32.totalorder %s2317_s0, %s1812_s21  ;;  %p1814_p10 = pneg %p2075_p6 }
  0x33   : > { %p1819_p13 = scmp.lt.u32.totalorder %s1812_s21, %s2317_s0 }
  0x34   : > { %p1815_p11 = pnand %p1814_p10, %p1813_p8 }
  0x36   : > { %p1816_p12 = pneg %p1815_p11 }
  0x38   : > { %p1821_p0 = pnand %p1819_p13, %p1816_p12 }
  0x3a   : > { %1824 = shalt.err (!%p1821_p0)
}
  0x3b   : > { %s1825_s22 = scalar_lea.vmem %s2066_s27, 1024  ;;  %p1833_p7 = scmp.lt.s32.totalorder %s2066_s27, %s2066_s27 }
  0x3c   : > { %p1826_p4 = scmp.ne.s32.totalorder %s2066_s27, %s1825_s22  ;;  %p1834_p2 = scmp.lt.s32.totalorder %s1825_s22, %s1825_s22 }
  0x3e   : > { %p1828_p1 = pnand %p1826_p4, %p1814_p10  ;;  %p1835_p3 = por %p1834_p2, %p1833_p7 }
  0x40   : > { %p1829_p9 = pneg %p1828_p1 }
  0x42   : > { %p1836_p5 = pnand %p1835_p3, %p1829_p9 }
  0x44   : > { %1839 = shalt.err (!%p1836_p5)
}
  0x45   : > { %s1944_s26 = smov 512   ;;  %s1945_s12 = smov 32  }
  0x46   : > { %1537 = dma.hbm_to_vmem [thread:$0]  (!%p2075_p6), %s2317_s0, 1024, %s2066_s27, [#allocation4], %s1944_s26, %s1944_s26, %s1945_s12  }
  0x47   : > { %s1840_s6 = scalar_lea.hbm %s2082_s7, 64  ;;  %p2331_p8 = scmp.ne.s32.totalorder %s2327_s29, 0 }
  0x48   : > { %p1841_p1 = scmp.ne.s32.totalorder %s2082_s7, %s1840_s6  ;;  %s1845_s11 = scalar_lea.hbm %s2319_s2, 512 }
  0x49   : > { %p2332_p7 = pneg %p2331_p8  ;;  %p1846_p2 = scmp.lt.u32.totalorder %s2082_s7, %s2319_s2 }
  0x4a   : > { %p1847_p3 = scmp.lt.u32.totalorder %s1845_s11, %s1840_s6  ;;  %p1849_p11 = scmp.lt.u32.totalorder %s1840_s6, %s2082_s7 }
  0x4b   : > { %p1843_p9 = pnand %p1841_p1, %p2332_p7 }
  0x4c   : > { %p1848_p10 = por %p1847_p3, %p1846_p2 }
  0x4d   : > { %p1844_p5 = pneg %p1843_p9 }
  0x4e   : > { %p1850_p12 = por %p1849_p11, %p1848_p10 }
  0x50   : > { %p1851_p13 = pnand %p1850_p12, %p1844_p5 }
  0x52   : > { %1854 = shalt.err (!%p1851_p13)
}
  0x53   : > { %s1855_s27 = scalar_lea.vmem %s2084_s9, 64  ;;  %p2333_p0 = pmov %p2332_p7 }
  0x54   : > { %p1856_p6 = scmp.ne.s32.totalorder %s2084_s9, %s1855_s27  ;;  %s1946_s4 = smov [#allocation8]  }
  0x55   : > { %s1860_s17 = sshll.u32 %s1946_s4, 4  ;;  %s1861_s17 = int_to_ptr.vmem [resolvable:$false] %s1860_s17 }
  0x56   : > { %p1858_p4 = pnand %p1856_p6, %p2333_p0  ;;  %s1862_s18 = scalar_lea.vmem %s1861_s17, 128 }
  0x57   : > { %p1863_p7 = scmp.lt.s32.totalorder %s2084_s9, %s1861_s17  ;;  %p1864_p9 = scmp.lt.s32.totalorder %s1862_s18, %s1855_s27 }
  0x58   : > { %p1859_p1 = pneg %p1858_p4 }
  0x59   : > { %p1865_p2 = por %p1864_p9, %p1863_p7 }
  0x5b   : > { %p1866_p3 = pnand %p1865_p2, %p1859_p1 }
  0x5d   : > { %1869 = shalt.err (!%p1866_p3)
}
  0x5e   : > { %1544 = dma.hbm_to_vmem [thread:$0]  (!%p2331_p8), %s2082_s7, 64, %s2084_s9, %s2019_s30  }
  0x5f   : > { %p2334_p5 = scmp.ne.s32.totalorder %s2329_s25, 0 }
  0x60   : > { %p2335_p10 = scmp.eq.s32.totalorder (!%p2334_p5), %s2048_s23, 0 }
  0x61   : > { %185 = sbr.rel (%p2334_p5) target bundleno = 504 (0x1f8), region = 32 }
  0x68   : > { %1913 = dma.done.wait (%p2335_p10), [#allocation4], 1024   ;;  %p2336_p11 = pmov %p2335_p10 }
  0x69   : > { %s191_s20 = sand.u32 1, %s2048_s23   ;;  %s193_s22 = sand.u32 1, %s1930_s13  }
  0x6a   : > { %1915 = vsyncadd (%p2336_p11), [#allocation4], 4294966272  ;;  %s1368_s26 = sshll.u32 %s193_s22, 10  ;;  %s192_s29 = scalar_lea.sflag [#allocation7], %s191_s20 }
  0x6b   : > { %s2139_s12 = scalar_lea.vmem [#allocation6], %s1368_s26  ;;  %p2337_p12 = scmp.ne.s32.totalorder %s2328_s24, 0 }
  0x6d   : > { %1917 = dma.done.wait (%p2337_p12), %s192_s29, 16448  }
  0x6e   : > { %1919 = vsyncadd (%p2337_p12), %s192_s29, 4294950848  ;;  %s2145_s30 = sshll.u32 %s193_s22, 2  ;;  %p2338_p8 = scmp.ne.s32.totalorder %s2048_s23, 0 }
  0x6f   : > { %s204_s25 = scalar_lea.vmem [#allocation8], %s2145_s30  ;;  %v231_v0 = vld [vmem:[#allocation3] sm:$0xff] (!%p2338_p8)  ;;  %v232_v1 = vld [vmem:[#allocation3 + $0x8] sm:$0xff] (!%p2338_p8)  ;;  %v233_v2 = vld [vmem:[#allocation3 + $0x10] sm:$0xff] (!%p2338_p8) }
  0x70   : > { %230 = sbr.rel (%p2338_p8) target bundleno = 119 (0x77), region = 48  ;;  %239 = vst [vmem:[#allocation2] sm:$0xff] (!%p2338_p8), %v231_v0  ;;  %240 = vst [vmem:[#allocation2 + $0x8] sm:$0xff] (!%p2338_p8), %v232_v1  ;;  %v234_v3 = vld [vmem:[#allocation3 + $0x18] sm:$0xff] (!%p2338_p8)  ;;  %v235_v4 = vld [vmem:[#allocation3 + $0x20] sm:$0xff] (!%p2338_p8) }
  0x71   : > { %241 = vst [vmem:[#allocation2 + $0x10] sm:$0xff] (!%p2338_p8), %v233_v2  ;;  %v236_v5 = vld [vmem:[#allocation3 + $0x28] sm:$0xff] (!%p2338_p8)  ;;  %242 = vst [vmem:[#allocation2 + $0x18] sm:$0xff] (!%p2338_p8), %v234_v3  ;;  %v237_v6 = vld [vmem:[#allocation3 + $0x30] sm:$0xff] (!%p2338_p8) }
  0x72   : > { %243 = vst [vmem:[#allocation2 + $0x20] sm:$0xff] (!%p2338_p8), %v235_v4  ;;  %244 = vst [vmem:[#allocation2 + $0x28] sm:$0xff] (!%p2338_p8), %v236_v5  ;;  %v238_v7 = vld [vmem:[#allocation3 + $0x38] sm:$0xff] (!%p2338_p8) }
  0x73   : > { %245 = vst [vmem:[#allocation2 + $0x30] sm:$0xff] (!%p2338_p8), %v237_v6  ;;  %246 = vst [vmem:[#allocation2 + $0x38] sm:$0xff] (!%p2338_p8), %v238_v7 }
  0x77 PF: > { %v1590_v8 = vld [vmem:[%s2139_s12 + $0x4] ss:$16 sps:$4 sm:$0xff]   ;;  %v1592_v9 = vld [vmem:[%s2139_s12 + $0xc] ss:$16 sps:$4 sm:$0xff]   ;;  %v1594_v10 = vld [vmem:[%s2139_s12] ss:$16 sps:$4 sm:$0xff]  }
  0x78   : > { %1049 = vmatprep.subr.bf16.mxu0 %v1590_v8  ;;  %v1595_v11 = vld [vmem:[%s2139_s12 + $0x8] ss:$16 sps:$4 sm:$0xff]   ;;  %1135 = vmatprep.subr.bf16.mxu1 %v1592_v9  ;;  %v1596_v12 = vld [vmem:[%s2139_s12 + $0x24] ss:$16 sps:$4 sm:$0xff]   ;;  %v1598_v13 = vld [vmem:[%s2139_s12 + $0x2c] ss:$16 sps:$4 sm:$0xff]  }
  0x79   : > { %1050 = vmatpush1.bf16.msra.mxu0 %v1594_v10  ;;  %1136 = vmatpush1.bf16.msra.mxu1 %v1595_v11  ;;  %v1600_v14 = vld [vmem:[%s2139_s12 + $0x20] ss:$16 sps:$4 sm:$0xff]   ;;  %v1601_v15 = vld [vmem:[%s2139_s12 + $0x28] ss:$16 sps:$4 sm:$0xff]   ;;  %v1602_v16 = vld [vmem:[%s2139_s12 + $0x44] ss:$16 sps:$4 sm:$0xff]  }
  0x7a   : > { %1051 = vmatprep.subr.bf16.mxu0 %v1596_v12  ;;  %1137 = vmatprep.subr.bf16.mxu1 %v1598_v13  ;;  %v1604_v17 = vld [vmem:[%s2139_s12 + $0x4c] ss:$16 sps:$4 sm:$0xff]   ;;  %v1606_v18 = vld [vmem:[%s2139_s12 + $0x40] ss:$16 sps:$4 sm:$0xff]   ;;  %v1607_v19 = vld [vmem:[%s2139_s12 + $0x48] ss:$16 sps:$4 sm:$0xff]  }
  0x7b   : > { %v1608_v20 = vld [vmem:[%s2139_s12 + $0x64] ss:$16 sps:$4 sm:$0xff]   ;;  %v1610_v21 = vld [vmem:[%s2139_s12 + $0x6c] ss:$16 sps:$4 sm:$0xff]   ;;  %v1612_v22 = vld [vmem:[%s2139_s12 + $0x60] ss:$16 sps:$4 sm:$0xff]  }
  0x7c   : > { %v1613_v23 = vld [vmem:[%s2139_s12 + $0x68] ss:$16 sps:$4 sm:$0xff]   ;;  %v1614_v24 = vld [vmem:[%s2139_s12 + $0x84] ss:$16 sps:$4 sm:$0xff]   ;;  %v1616_v25 = vld [vmem:[%s2139_s12 + $0x8c] ss:$16 sps:$4 sm:$0xff]  }
  0x7d   : > { %1052 = vmatpush1.bf16.msra.mxu0 %v1600_v14  ;;  %1138 = vmatpush1.bf16.msra.mxu1 %v1601_v15  ;;  %v1618_v26 = vld [vmem:[%s2139_s12 + $0x80] ss:$16 sps:$4 sm:$0xff]   ;;  %v1619_v27 = vld [vmem:[%s2139_s12 + $0x88] ss:$16 sps:$4 sm:$0xff]   ;;  %v1620_v28 = vld [vmem:[%s2139_s12 + $0xa4] ss:$16 sps:$4 sm:$0xff]  }
  0x7e   : > { %1053 = vmatprep.subr.bf16.mxu0 %v1602_v16  ;;  %1139 = vmatprep.subr.bf16.mxu1 %v1604_v17  ;;  %v1622_v29 = vld [vmem:[%s2139_s12 + $0xac] ss:$16 sps:$4 sm:$0xff]   ;;  %v1624_v30 = vld [vmem:[%s2139_s12 + $0xa0] ss:$16 sps:$4 sm:$0xff]   ;;  %v1625_v31 = vld [vmem:[%s2139_s12 + $0xa8] ss:$16 sps:$4 sm:$0xff]  }
  0x7f   : > { %v1626_v32 = vld [vmem:[%s2139_s12 + $0xc4] ss:$16 sps:$4 sm:$0xff]   ;;  %v1628_v33 = vld [vmem:[%s2139_s12 + $0xcc] ss:$16 sps:$4 sm:$0xff]   ;;  %v1630_v34 = vld [vmem:[%s2139_s12 + $0xc0] ss:$16 sps:$4 sm:$0xff]  }
  0x80   : > { %v1631_v35 = vld [vmem:[%s2139_s12 + $0xc8] ss:$16 sps:$4 sm:$0xff]   ;;  %v1632_v36 = vld [vmem:[%s2139_s12 + $0xe4] ss:$16 sps:$4 sm:$0xff]   ;;  %v1634_v37 = vld [vmem:[%s2139_s12 + $0xec] ss:$16 sps:$4 sm:$0xff]  }
  0x81   : > { %1054 = vmatpush1.bf16.msra.mxu0 %v1606_v18  ;;  %1140 = vmatpush1.bf16.msra.mxu1 %v1607_v19  ;;  %v1636_v38 = vld [vmem:[%s2139_s12 + $0xe0] ss:$16 sps:$4 sm:$0xff]   ;;  %v1637_v39 = vld [vmem:[%s2139_s12 + $0xe8] ss:$16 sps:$4 sm:$0xff]   ;;  %v1638_v40 = vld [vmem:[%s2139_s12 + $0x104] ss:$16 sps:$4 sm:$0xff]  }
  0x82   : > { %1055 = vmatprep.subr.bf16.mxu0 %v1608_v20  ;;  %1141 = vmatprep.subr.bf16.mxu1 %v1610_v21  ;;  %v1640_v41 = vld [vmem:[%s2139_s12 + $0x10c] ss:$16 sps:$4 sm:$0xff]   ;;  %v1642_v42 = vld [vmem:[%s2139_s12 + $0x100] ss:$16 sps:$4 sm:$0xff]   ;;  %v1643_v43 = vld [vmem:[%s2139_s12 + $0x108] ss:$16 sps:$4 sm:$0xff]  }
  0x83   : > { %v1644_v44 = vld [vmem:[%s2139_s12 + $0x124] ss:$16 sps:$4 sm:$0xff]   ;;  %v1646_v45 = vld [vmem:[%s2139_s12 + $0x12c] ss:$16 sps:$4 sm:$0xff]   ;;  %v1648_v46 = vld [vmem:[%s2139_s12 + $0x120] ss:$16 sps:$4 sm:$0xff]  }
  0x84   : > { %v1649_v47 = vld [vmem:[%s2139_s12 + $0x128] ss:$16 sps:$4 sm:$0xff]   ;;  %v1650_v48 = vld [vmem:[%s2139_s12 + $0x144] ss:$16 sps:$4 sm:$0xff]   ;;  %v1652_v49 = vld [vmem:[%s2139_s12 + $0x14c] ss:$16 sps:$4 sm:$0xff]  }
  0x85   : > { %1056 = vmatpush1.bf16.msra.mxu0 %v1612_v22  ;;  %1142 = vmatpush1.bf16.msra.mxu1 %v1613_v23  ;;  %v1654_v50 = vld [vmem:[%s2139_s12 + $0x140] ss:$16 sps:$4 sm:$0xff]   ;;  %v1655_v51 = vld [vmem:[%s2139_s12 + $0x148] ss:$16 sps:$4 sm:$0xff]   ;;  %v1656_v52 = vld [vmem:[%s2139_s12 + $0x164] ss:$16 sps:$4 sm:$0xff]  }
  0x86   : > { %1057 = vmatprep.subr.bf16.mxu0 %v1614_v24  ;;  %1143 = vmatprep.subr.bf16.mxu1 %v1616_v25  ;;  %v1658_v53 = vld [vmem:[%s2139_s12 + $0x16c] ss:$16 sps:$4 sm:$0xff]   ;;  %v1660_v56 = vld [vmem:[%s2139_s12 + $0x160] ss:$16 sps:$4 sm:$0xff]   ;;  %v1661_v57 = vld [vmem:[%s2139_s12 + $0x168] ss:$16 sps:$4 sm:$0xff]  }
  0x87   : > { %v248_v54 = vld [vmem:[#allocation2 + $0x8] sm:$0xff]  ;;  %v1662_v59 = vld [vmem:[%s2139_s12 + $0x184] ss:$16 sps:$4 sm:$0xff]   ;;  %v1666_v61 = vld [vmem:[%s2139_s12 + $0x180] ss:$16 sps:$4 sm:$0xff]   ;;  %p1499_p13 = scmp.ne.s32.totalorder %s2048_s23, 7 }
  0x88   : > { %v252_v55 = vld [vmem:[#allocation2 + $0x28] sm:$0xff]  ;;  %v1668_v63 = vld [vmem:[%s2139_s12 + $0x1a4] ss:$16 sps:$4 sm:$0xff]   ;;  %v1672_v1 = vld [vmem:[%s2139_s12 + $0x1a0] ss:$16 sps:$4 sm:$0xff]  }
  0x89   : > { %1058 = vmatpush1.bf16.msra.mxu0 %v1618_v26  ;;  %1144 = vmatpush1.bf16.msra.mxu1 %v1619_v27  ;;  %v256_v58 = vpack.c.bf16 %v252_v55, %v248_v54  ;;  %v1664_v60 = vld [vmem:[%s2139_s12 + $0x18c] ss:$16 sps:$4 sm:$0xff]   ;;  %v1667_v62 = vld [vmem:[%s2139_s12 + $0x188] ss:$16 sps:$4 sm:$0xff]   ;;  %v1674_v3 = vld [vmem:[%s2139_s12 + $0x1c4] ss:$16 sps:$4 sm:$0xff]  }
  0x8a   : > { %1059 = vmatprep.subr.bf16.mxu0 %v1620_v28  ;;  %1145 = vmatprep.subr.bf16.mxu1 %v1622_v29  ;;  %v1670_v0 = vld [vmem:[%s2139_s12 + $0x1ac] ss:$16 sps:$4 sm:$0xff]   ;;  %v1673_v2 = vld [vmem:[%s2139_s12 + $0x1a8] ss:$16 sps:$4 sm:$0xff]   ;;  %v1678_v5 = vld [vmem:[%s2139_s12 + $0x1c0] ss:$16 sps:$4 sm:$0xff]  }
  0x8b   : > { %1081 = vmatprep.mubr.bf16.mxu0 %v256_v58  ;;  %1167 = vmatprep.mubr.bf16.mxu1 %v256_v58  ;;  %v1676_v4 = vld [vmem:[%s2139_s12 + $0x1cc] ss:$16 sps:$4 sm:$0xff]   ;;  %v1679_v6 = vld [vmem:[%s2139_s12 + $0x1c8] ss:$16 sps:$4 sm:$0xff]   ;;  %v1680_v7 = vld [vmem:[%s2139_s12 + $0x1e4] ss:$16 sps:$4 sm:$0xff]  }
  0x8c   : > { %v1682_v8 = vld [vmem:[%s2139_s12 + $0x1ec] ss:$16 sps:$4 sm:$0xff]   ;;  %v1684_v9 = vld [vmem:[%s2139_s12 + $0x1e0] ss:$16 sps:$4 sm:$0xff]   ;;  %v1685_v10 = vld [vmem:[%s2139_s12 + $0x1e8] ss:$16 sps:$4 sm:$0xff]  }
  0x8d   : > { %1060 = vmatpush1.bf16.msra.mxu0 %v1624_v30  ;;  %1146 = vmatpush1.bf16.msra.mxu1 %v1625_v31  ;;  %v1688_v11 = vld [vmem:[%s2139_s12 + $0x204] ss:$16 sps:$4 sm:$0xff]   ;;  %v1691_v14 = vld [vmem:[%s2139_s12 + $0x20c] ss:$16 sps:$4 sm:$0xff]   ;;  %v1686_v15 = vld [vmem:[%s2139_s12 + $0x200] ss:$16 sps:$4 sm:$0xff]  }
  0x8e   : > { %1061 = vmatprep.subr.bf16.mxu0 %v1626_v32  ;;  %1147 = vmatprep.subr.bf16.mxu1 %v1628_v33  ;;  %v247_v12 = vld [vmem:[#allocation2] sm:$0xff]  ;;  %v1689_v16 = vld [vmem:[%s2139_s12 + $0x208] ss:$16 sps:$4 sm:$0xff]   ;;  %v1697_v19 = vld [vmem:[%s2139_s12 + $0x22c] ss:$16 sps:$4 sm:$0xff]  }
  0x8f   : > { %v251_v13 = vld [vmem:[#allocation2 + $0x20] sm:$0xff]  ;;  %v1695_v21 = vld [vmem:[%s2139_s12 + $0x228] ss:$16 sps:$4 sm:$0xff]   ;;  %v1703_v23 = vld [vmem:[%s2139_s12 + $0x24c] ss:$16 sps:$4 sm:$0xff]  }
  0x90   : > { %v255_v17 = vpack.c.bf16 %v251_v13, %v247_v12  ;;  %v1694_v18 = vld [vmem:[%s2139_s12 + $0x224] ss:$16 sps:$4 sm:$0xff]   ;;  %v1692_v20 = vld [vmem:[%s2139_s12 + $0x220] ss:$16 sps:$4 sm:$0xff]   ;;  %v1701_v25 = vld [vmem:[%s2139_s12 + $0x248] ss:$16 sps:$4 sm:$0xff]  }
  0x91   : > { %1062 = vmatpush1.bf16.msra.mxu0 %v1630_v34  ;;  %1148 = vmatpush1.bf16.msra.mxu1 %v1631_v35  ;;  %v1700_v22 = vld [vmem:[%s2139_s12 + $0x244] ss:$16 sps:$4 sm:$0xff]   ;;  %v1698_v24 = vld [vmem:[%s2139_s12 + $0x240] ss:$16 sps:$4 sm:$0xff]   ;;  %v1709_v27 = vld [vmem:[%s2139_s12 + $0x26c] ss:$16 sps:$4 sm:$0xff]  }
  0x92   : > { %1063 = vmatprep.subr.bf16.mxu0 %v1632_v36  ;;  %1149 = vmatprep.subr.bf16.mxu1 %v1634_v37  ;;  %v1706_v26 = vld [vmem:[%s2139_s12 + $0x264] ss:$16 sps:$4 sm:$0xff]   ;;  %v1704_v28 = vld [vmem:[%s2139_s12 + $0x260] ss:$16 sps:$4 sm:$0xff]   ;;  %v1707_v29 = vld [vmem:[%s2139_s12 + $0x268] ss:$16 sps:$4 sm:$0xff]  }
  0x93   : > { %v1712_v30 = vld [vmem:[%s2139_s12 + $0x284] ss:$16 sps:$4 sm:$0xff]   ;;  %v1715_v31 = vld [vmem:[%s2139_s12 + $0x28c] ss:$16 sps:$4 sm:$0xff]   ;;  %v1710_v32 = vld [vmem:[%s2139_s12 + $0x280] ss:$16 sps:$4 sm:$0xff]  }
  0x94   : > { %v1713_v33 = vld [vmem:[%s2139_s12 + $0x288] ss:$16 sps:$4 sm:$0xff]   ;;  %v1718_v34 = vld [vmem:[%s2139_s12 + $0x2a4] ss:$16 sps:$4 sm:$0xff]   ;;  %v1721_v35 = vld [vmem:[%s2139_s12 + $0x2ac] ss:$16 sps:$4 sm:$0xff]  }
  0x95   : > { %1064 = vmatpush1.bf16.msra.mxu0 %v1636_v38  ;;  %1150 = vmatpush1.bf16.msra.mxu1 %v1637_v39  ;;  %v1716_v36 = vld [vmem:[%s2139_s12 + $0x2a0] ss:$16 sps:$4 sm:$0xff]   ;;  %v1719_v37 = vld [vmem:[%s2139_s12 + $0x2a8] ss:$16 sps:$4 sm:$0xff]   ;;  %v1724_v38 = vld [vmem:[%s2139_s12 + $0x2c4] ss:$16 sps:$4 sm:$0xff]  }
  0x96   : > { %1065 = vmatprep.subr.bf16.mxu0 %v1638_v40  ;;  %1151 = vmatprep.subr.bf16.mxu1 %v1640_v41  ;;  %v1727_v39 = vld [vmem:[%s2139_s12 + $0x2cc] ss:$16 sps:$4 sm:$0xff]   ;;  %v1740_v55 = vld [vmem:[%s2139_s12 + $0x320] ss:$16 sps:$4 sm:$0xff]   ;;  %v1773_v12 = vld [vmem:[%s2139_s12 + $0x3c8] ss:$16 sps:$4 sm:$0xff]  }
  0x97   : > { %v250_v40 = vld [vmem:[#allocation2 + $0x18] sm:$0xff]  ;;  %v1778_v13 = vld [vmem:[%s2139_s12 + $0x3e4] ss:$16 sps:$4 sm:$0xff]  }
  0x98   : > { %v254_v41 = vld [vmem:[#allocation2 + $0x38] sm:$0xff] }
  0x99   : > { %1066 = vmatpush1.bf16.msra.mxu0 %v1642_v42  ;;  %1152 = vmatpush1.bf16.msra.mxu1 %v1643_v43  ;;  %v1722_v42 = vld [vmem:[%s2139_s12 + $0x2c0] ss:$16 sps:$4 sm:$0xff]   ;;  %v1725_v43 = vld [vmem:[%s2139_s12 + $0x2c8] ss:$16 sps:$4 sm:$0xff]   ;;  %v1745_v54 = vld [vmem:[%s2139_s12 + $0x32c] ss:$16 sps:$4 sm:$0xff]  }
  0x9a   : > { %1067 = vmatprep.subr.bf16.mxu0 %v1644_v44  ;;  %1153 = vmatprep.subr.bf16.mxu1 %v1646_v45  ;;  %v258_v44 = vpack.c.bf16 %v254_v41, %v250_v40  ;;  %v1730_v45 = vld [vmem:[%s2139_s12 + $0x2e4] ss:$16 sps:$4 sm:$0xff]   ;;  %v1751_v58 = vld [vmem:[%s2139_s12 + $0x34c] ss:$16 sps:$4 sm:$0xff]  }
  0x9d   : > { %1068 = vmatpush1.bf16.msra.mxu0 %v1648_v46  ;;  %1154 = vmatpush1.bf16.msra.mxu1 %v1649_v47  ;;  %v1733_v46 = vld [vmem:[%s2139_s12 + $0x2ec] ss:$16 sps:$4 sm:$0xff]   ;;  %v1728_v47 = vld [vmem:[%s2139_s12 + $0x2e0] ss:$16 sps:$4 sm:$0xff]  }
  0x9e   : > { %1069 = vmatprep.subr.bf16.mxu0 %v1650_v48  ;;  %1155 = vmatprep.subr.bf16.mxu1 %v1652_v49  ;;  %v1731_v48 = vld [vmem:[%s2139_s12 + $0x2e8] ss:$16 sps:$4 sm:$0xff]   ;;  %v1736_v49 = vld [vmem:[%s2139_s12 + $0x304] ss:$16 sps:$4 sm:$0xff]  }
  0xa1   : > { %1070 = vmatpush1.bf16.msra.mxu0 %v1654_v50  ;;  %1156 = vmatpush1.bf16.msra.mxu1 %v1655_v51  ;;  %v1739_v50 = vld [vmem:[%s2139_s12 + $0x30c] ss:$16 sps:$4 sm:$0xff]   ;;  %v1734_v51 = vld [vmem:[%s2139_s12 + $0x300] ss:$16 sps:$4 sm:$0xff]  }
  0xa2   : > { %1071 = vmatprep.subr.bf16.mxu0 %v1656_v52  ;;  %1157 = vmatprep.subr.bf16.mxu1 %v1658_v53  ;;  %v1737_v52 = vld [vmem:[%s2139_s12 + $0x308] ss:$16 sps:$4 sm:$0xff]   ;;  %v1742_v53 = vld [vmem:[%s2139_s12 + $0x324] ss:$16 sps:$4 sm:$0xff]  }
  0xa5   : > { %1072 = vmatpush1.bf16.msra.mxu0 %v1660_v56  ;;  %1158 = vmatpush1.bf16.msra.mxu1 %v1661_v57  ;;  %v1743_v56 = vld [vmem:[%s2139_s12 + $0x328] ss:$16 sps:$4 sm:$0xff]   ;;  %v1748_v57 = vld [vmem:[%s2139_s12 + $0x344] ss:$16 sps:$4 sm:$0xff]  }
  0xa6   : > { %1073 = vmatprep.subr.bf16.mxu0 %v1662_v59  ;;  %1159 = vmatprep.subr.bf16.mxu1 %v1664_v60  ;;  %v1746_v59 = vld [vmem:[%s2139_s12 + $0x340] ss:$16 sps:$4 sm:$0xff]   ;;  %v1749_v60 = vld [vmem:[%s2139_s12 + $0x348] ss:$16 sps:$4 sm:$0xff]  }
  0xa9   : > { %1074 = vmatpush1.bf16.msra.mxu0 %v1666_v61  ;;  %1160 = vmatpush1.bf16.msra.mxu1 %v1667_v62  ;;  %v1754_v61 = vld [vmem:[%s2139_s12 + $0x364] ss:$16 sps:$4 sm:$0xff]   ;;  %v1757_v62 = vld [vmem:[%s2139_s12 + $0x36c] ss:$16 sps:$4 sm:$0xff]  }
  0xaa   : > { %1075 = vmatprep.subr.bf16.mxu0 %v1668_v63  ;;  %1161 = vmatprep.subr.bf16.mxu1 %v1670_v0  ;;  %v1752_v63 = vld [vmem:[%s2139_s12 + $0x360] ss:$16 sps:$4 sm:$0xff]   ;;  %v1755_v0 = vld [vmem:[%s2139_s12 + $0x368] ss:$16 sps:$4 sm:$0xff]  }
  0xad   : > { %1076 = vmatpush1.bf16.msra.mxu0 %v1672_v1  ;;  %1162 = vmatpush1.bf16.msra.mxu1 %v1673_v2  ;;  %v1760_v1 = vld [vmem:[%s2139_s12 + $0x384] ss:$16 sps:$4 sm:$0xff]   ;;  %v1763_v2 = vld [vmem:[%s2139_s12 + $0x38c] ss:$16 sps:$4 sm:$0xff]  }
  0xae   : > { %1077 = vmatprep.subr.bf16.mxu0 %v1674_v3  ;;  %1163 = vmatprep.subr.bf16.mxu1 %v1676_v4  ;;  %v1758_v3 = vld [vmem:[%s2139_s12 + $0x380] ss:$16 sps:$4 sm:$0xff]   ;;  %v1761_v4 = vld [vmem:[%s2139_s12 + $0x388] ss:$16 sps:$4 sm:$0xff]  }
  0xb1   : > { %1078 = vmatpush1.bf16.msra.mxu0 %v1678_v5  ;;  %1164 = vmatpush1.bf16.msra.mxu1 %v1679_v6  ;;  %v1766_v5 = vld [vmem:[%s2139_s12 + $0x3a4] ss:$16 sps:$4 sm:$0xff]   ;;  %v1769_v6 = vld [vmem:[%s2139_s12 + $0x3ac] ss:$16 sps:$4 sm:$0xff]  }
  0xb2   : > { %1079 = vmatprep.subr.bf16.mxu0 %v1680_v7  ;;  %1165 = vmatprep.subr.bf16.mxu1 %v1682_v8  ;;  %v1764_v7 = vld [vmem:[%s2139_s12 + $0x3a0] ss:$16 sps:$4 sm:$0xff]   ;;  %v1767_v8 = vld [vmem:[%s2139_s12 + $0x3a8] ss:$16 sps:$4 sm:$0xff]  }
  0xb5   : > { %1080 = vmatpush1.bf16.msra.mxu0 %v1684_v9  ;;  %1166 = vmatpush1.bf16.msra.mxu1 %v1685_v10  ;;  %v1772_v9 = vld [vmem:[%s2139_s12 + $0x3c4] ss:$16 sps:$4 sm:$0xff]   ;;  %v1775_v10 = vld [vmem:[%s2139_s12 + $0x3cc] ss:$16 sps:$4 sm:$0xff]  }
  0xb6   : > { %1092 = vmatprep.subr.bf16.mxu0 %v1688_v11  ;;  %1178 = vmatprep.subr.bf16.mxu1 %v1691_v14  ;;  %v1770_v11 = vld [vmem:[%s2139_s12 + $0x3c0] ss:$16 sps:$4 sm:$0xff]   ;;  %v1781_v14 = vld [vmem:[%s2139_s12 + $0x3ec] ss:$16 sps:$4 sm:$0xff]  }
  0xb8   : > { %1082 = vmatmul.mubr.bf16.vlgmr.msra.gmra.mrb[0].mxu0 %v255_v17  ;;  %1168 = vmatmul.mubr.bf16.vlgmr.msra.gmra.mrb[0].mxu1 %v255_v17  ;;  %v249_v17 = vld [vmem:[#allocation2 + $0x10] sm:$0xff] }
  0xb9   : > { %1093 = vmatpush1.bf16.msra.mxu0 %v1686_v15  ;;  %1179 = vmatpush1.bf16.msra.mxu1 %v1689_v16  ;;  %v1776_v15 = vld [vmem:[%s2139_s12 + $0x3e0] ss:$16 sps:$4 sm:$0xff]   ;;  %v1779_v16 = vld [vmem:[%s2139_s12 + $0x3e8] ss:$16 sps:$4 sm:$0xff]  }
  0xba   : > { %1094 = vmatprep.subr.bf16.mxu0 %v1694_v18  ;;  %1180 = vmatprep.subr.bf16.mxu1 %v1697_v19  ;;  %v253_v18 = vld [vmem:[#allocation2 + $0x30] sm:$0xff] }
  0xbb   : > { %1124 = vmatprep.mubr.bf16.mxu0 %v258_v44  ;;  %1210 = vmatprep.mubr.bf16.mxu1 %v258_v44  ;;  %v257_v19 = vpack.c.bf16 %v253_v18, %v249_v17 }
  0xbd   : > { %1095 = vmatpush1.bf16.msra.mxu0 %v1692_v20  ;;  %1181 = vmatpush1.bf16.msra.mxu1 %v1695_v21  ;;  %v389_v20 = vlaneseq }
  0xbe   : > { %1096 = vmatprep.subr.bf16.mxu0 %v1700_v22  ;;  %1182 = vmatprep.subr.bf16.mxu1 %v1703_v23 }
  0xbf   : > { %v390_v21 = vshrl.u32 %v389_v20, 7 }
  0xc1   : > { %1097 = vmatpush1.bf16.msra.mxu0 %v1698_v24  ;;  %1183 = vmatpush1.bf16.msra.mxu1 %v1701_v25  ;;  %v391_v22 = vsub.s32 0, %v390_v21  ;;  %v399_v23 = vsub.s32 2, %v390_v21  ;;  %v387_v24 = vld [vmem:[%s204_s25] sm:$0xf]  ;;  %v395_v25 = vsub.s32 1, %v390_v21 }
  0xc2   : > { %1098 = vmatprep.subr.bf16.mxu0 %v1706_v26  ;;  %1184 = vmatprep.subr.bf16.mxu1 %v1709_v27  ;;  %v403_v26 = vsub.s32 3, %v390_v21 }
  0xc3   : > { %v392_v27 = vrot.slane %v387_v24, %v391_v22 }
  0xc5   : > { %1099 = vmatpush1.bf16.msra.mxu0 %v1704_v28  ;;  %1185 = vmatpush1.bf16.msra.mxu1 %v1707_v29  ;;  %v400_v28 = vrot.slane %v387_v24, %v399_v23  ;;  %v396_v29 = vrot.slane %v387_v24, %v395_v25 }
  0xc6   : > { %1100 = vmatprep.subr.bf16.mxu0 %v1712_v30  ;;  %1186 = vmatprep.subr.bf16.mxu1 %v1715_v31  ;;  %v404_v30 = vrot.slane %v387_v24, %v403_v26 }
  0xc9   : > { %1101 = vmatpush1.bf16.msra.mxu0 %v1710_v32  ;;  %1187 = vmatpush1.bf16.msra.mxu1 %v1713_v33 }
  0xca   : > { %1102 = vmatprep.subr.bf16.mxu0 %v1718_v34  ;;  %1188 = vmatprep.subr.bf16.mxu1 %v1721_v35 }
  0xcd   : > { %1103 = vmatpush1.bf16.msra.mxu0 %v1716_v36  ;;  %1189 = vmatpush1.bf16.msra.mxu1 %v1719_v37 }
  0xce   : > { %1104 = vmatprep.subr.bf16.mxu0 %v1724_v38  ;;  %1190 = vmatprep.subr.bf16.mxu1 %v1727_v39 }
  0xd1   : > { %1105 = vmatpush1.bf16.msra.mxu0 %v1722_v42  ;;  %1191 = vmatpush1.bf16.msra.mxu1 %v1725_v43 }
  0xd2   : > { %1106 = vmatprep.subr.bf16.mxu0 %v1730_v45  ;;  %1192 = vmatprep.subr.bf16.mxu1 %v1733_v46 }
  0xd5   : > { %1107 = vmatpush1.bf16.msra.mxu0 %v1728_v47  ;;  %1193 = vmatpush1.bf16.msra.mxu1 %v1731_v48 }
  0xd6   : > { %1108 = vmatprep.subr.bf16.mxu0 %v1736_v49  ;;  %1194 = vmatprep.subr.bf16.mxu1 %v1739_v50 }
  0xd9   : > { %1109 = vmatpush1.bf16.msra.mxu0 %v1734_v51  ;;  %1195 = vmatpush1.bf16.msra.mxu1 %v1737_v52 }
  0xda   : > { %1110 = vmatprep.subr.bf16.mxu0 %v1742_v53  ;;  %1196 = vmatprep.subr.bf16.mxu1 %v1745_v54 }
  0xdd   : > { %1111 = vmatpush1.bf16.msra.mxu0 %v1740_v55  ;;  %1197 = vmatpush1.bf16.msra.mxu1 %v1743_v56 }
  0xde   : > { %1112 = vmatprep.subr.bf16.mxu0 %v1748_v57  ;;  %1198 = vmatprep.subr.bf16.mxu1 %v1751_v58 }
  0xe1   : > { %1113 = vmatpush1.bf16.msra.mxu0 %v1746_v59  ;;  %1199 = vmatpush1.bf16.msra.mxu1 %v1749_v60 }
  0xe2   : > { %1114 = vmatprep.subr.bf16.mxu0 %v1754_v61  ;;  %1200 = vmatprep.subr.bf16.mxu1 %v1757_v62 }
  0xe5   : > { %1115 = vmatpush1.bf16.msra.mxu0 %v1752_v63  ;;  %1201 = vmatpush1.bf16.msra.mxu1 %v1755_v0 }
  0xe6   : > { %1116 = vmatprep.subr.bf16.mxu0 %v1760_v1  ;;  %1202 = vmatprep.subr.bf16.mxu1 %v1763_v2 }
  0xe9   : > { %1117 = vmatpush1.bf16.msra.mxu0 %v1758_v3  ;;  %1203 = vmatpush1.bf16.msra.mxu1 %v1761_v4 }
  0xea   : > { %1118 = vmatprep.subr.bf16.mxu0 %v1766_v5  ;;  %1204 = vmatprep.subr.bf16.mxu1 %v1769_v6 }
  0xed   : > { %1119 = vmatpush1.bf16.msra.mxu0 %v1764_v7  ;;  %1205 = vmatpush1.bf16.msra.mxu1 %v1767_v8 }
  0xee   : > { %1120 = vmatprep.subr.bf16.mxu0 %v1772_v9  ;;  %1206 = vmatprep.subr.bf16.mxu1 %v1775_v10 }
  0xf1   : > { %1121 = vmatpush1.bf16.msra.mxu0 %v1770_v11  ;;  %1207 = vmatpush1.bf16.msra.mxu1 %v1773_v12 }
  0xf2   : > { %1122 = vmatprep.subr.bf16.mxu0 %v1778_v13  ;;  %1208 = vmatprep.subr.bf16.mxu1 %v1781_v14 }
  0xf5   : > { %1123 = vmatpush1.bf16.msra.mxu0 %v1776_v15  ;;  %1209 = vmatpush1.bf16.msra.mxu1 %v1779_v16 }
  0xf8   : > { %1125 = vmatmul.mubr.bf16.vlgmr.msra.gmra.mrb[0].mxu0 %v257_v19  ;;  %1211 = vmatmul.mubr.bf16.vlgmr.msra.gmra.mrb[0].mxu1 %v257_v19 }
 0x1cb   : > { %v1126_v31 = vpop.f32.mrb[0].mxu0  ;;  %v1212_v32 = vpop.f32.mrb[0].mxu1 }
 0x1cc   : > { %v1506_v33 = vadd.f32 %v1126_v31, %v392_v27  ;;  %v1510_v34 = vadd.f32 %v1212_v32, %v400_v28  ;;  %v1128_v35 = vpop.f32.mrb[1].mxu0  ;;  %v1214_v36 = vpop.f32.mrb[1].mxu1 }
 0x1cd   : > { %v1507_v37 = vadd.f32 %v1128_v35, %v396_v29  ;;  %v1511_v38 = vadd.f32 %v1214_v36, %v404_v30  ;;  %v1130_v39 = vpop.f32.mrb[2].mxu0  ;;  %v1216_v40 = vpop.f32.mrb[2].mxu1 }
 0x1ce   : > { %v1221_v41 = vmul.f32 0.2, %v1506_v33  ;;  %v1223_v42 = vmul.f32 0.2, %v1510_v34  ;;  %v1508_v43 = vadd.f32 %v1130_v39, %v392_v27  ;;  %v1512_v44 = vadd.f32 %v1216_v40, %v400_v28  ;;  %v1132_v45 = vpop.f32.mrb[3].mxu0  ;;  %v1218_v46 = vpop.f32.mrb[3].mxu1 }
 0x1cf   : > { %v1222_v47 = vmul.f32 0.2, %v1507_v37  ;;  %v1224_v48 = vmul.f32 0.2, %v1511_v38  ;;  %v1509_v49 = vadd.f32 %v1132_v45, %v396_v29  ;;  %v1513_v50 = vadd.f32 %v1218_v46, %v404_v30  ;;  %1248 = sbr.rel (%p1499_p13) target bundleno = 478 (0x1de), region = 52 }
 0x1d0   : > { %v1229_v51 = vmax.f32 %v1506_v33, %v1221_v41  ;;  %v1231_v52 = vmax.f32 %v1510_v34, %v1223_v42  ;;  %v1225_v53 = vmul.f32 0.2, %v1508_v43  ;;  %v1227_v54 = vmul.f32 0.2, %v1512_v44 }
 0x1d1   : > { %v1230_v55 = vmax.f32 %v1507_v37, %v1222_v47  ;;  %v1232_v56 = vmax.f32 %v1511_v38, %v1224_v48  ;;  %v1226_v57 = vmul.f32 0.2, %v1509_v49  ;;  %v1228_v58 = vmul.f32 0.2, %v1513_v50 }
 0x1d2   : > { %1237 = vst [vmem:[#allocation2] sm:$0xff] %v1229_v51  ;;  %1239 = vst [vmem:[#allocation2 + $0x10] sm:$0xff] %v1231_v52  ;;  %v1233_v59 = vmax.f32 %v1508_v43, %v1225_v53  ;;  %v1235_v60 = vmax.f32 %v1512_v44, %v1227_v54 }
 0x1d3   : > { %1238 = vst [vmem:[#allocation2 + $0x8] sm:$0xff] %v1230_v55  ;;  %1240 = vst [vmem:[#allocation2 + $0x18] sm:$0xff] %v1232_v56  ;;  %v1234_v61 = vmax.f32 %v1509_v49, %v1226_v57  ;;  %v1236_v62 = vmax.f32 %v1513_v50, %v1228_v58 }
 0x1d4   : > { %1241 = vst [vmem:[#allocation2 + $0x20] sm:$0xff] %v1233_v59  ;;  %1243 = vst [vmem:[#allocation2 + $0x30] sm:$0xff] %v1235_v60 }
 0x1d5   : > { %1242 = vst [vmem:[#allocation2 + $0x28] sm:$0xff] %v1234_v61  ;;  %1244 = vst [vmem:[#allocation2 + $0x38] sm:$0xff] %v1236_v62 }
 0x1d9   : > { %v1249_v63 = vld [vmem:[#allocation2] sm:$0xff]  ;;  %v1251_v1 = vld [vmem:[#allocation2 + $0x10] sm:$0xff] }
 0x1da   : > { %v1250_v0 = vld [vmem:[#allocation2 + $0x8] sm:$0xff]  ;;  %1257 = vst [vmem:[#allocation9] sm:$0xff] %v1249_v63  ;;  %1259 = vst [vmem:[#allocation9 + $0x10] sm:$0xff] %v1251_v1  ;;  %v1252_v2 = vld [vmem:[#allocation2 + $0x18] sm:$0xff] }
 0x1db   : > { %1258 = vst [vmem:[#allocation9 + $0x8] sm:$0xff] %v1250_v0  ;;  %v1253_v3 = vld [vmem:[#allocation2 + $0x20] sm:$0xff]  ;;  %1260 = vst [vmem:[#allocation9 + $0x18] sm:$0xff] %v1252_v2  ;;  %v1255_v5 = vld [vmem:[#allocation2 + $0x30] sm:$0xff] }
 0x1dc   : > { %v1254_v4 = vld [vmem:[#allocation2 + $0x28] sm:$0xff]  ;;  %1261 = vst [vmem:[#allocation9 + $0x20] sm:$0xff] %v1253_v3  ;;  %v1256_v6 = vld [vmem:[#allocation2 + $0x38] sm:$0xff]  ;;  %1263 = vst [vmem:[#allocation9 + $0x30] sm:$0xff] %v1255_v5 }
 0x1dd   : > { %1262 = vst [vmem:[#allocation9 + $0x28] sm:$0xff] %v1254_v4  ;;  %1264 = vst [vmem:[#allocation9 + $0x38] sm:$0xff] %v1256_v6 }
 0x1de PF: > { %p1548_p6 = scmp.eq.s32.totalorder %s2048_s23, 7  ;;  %s1947_s24 = smov [#allocation9]  }
 0x1df   : > { %s1271_s7 = sshll.u32 %s1947_s24, 4  ;;  %s1272_s7 = int_to_ptr.vmem [resolvable:$true] %s1271_s7 }
 0x1e0   : > { %s1870_s9 = scalar_lea.vmem %s1272_s7, 1024  ;;  %p1877_p7 = scmp.lt.s32.totalorder %s1272_s7, %s1272_s7 }
 0x1e1   : > { %p1871_p0 = scmp.ne.s32.totalorder %s1272_s7, %s1870_s9  ;;  %p1878_p9 = scmp.lt.s32.totalorder %s1870_s9, %s1870_s9 }
 0x1e3   : > { %p1872_p4 = pnand %p1871_p0, %p1548_p6  ;;  %p1879_p2 = por %p1878_p9, %p1877_p7 }
 0x1e5   : > { %p1873_p1 = pneg %p1872_p4 }
 0x1e7   : > { %p1880_p3 = pnand %p1879_p2, %p1873_p1 }
 0x1e9   : > { %1883 = shalt.err (!%p1880_p3)
}
 0x1ea   : > { %s1884_s6 = scalar_lea.hbm %s2320_s3, 1024 }
 0x1eb   : > { %p1885_p5 = scmp.ne.s32.totalorder %s2320_s3, %s1884_s6  ;;  %p1890_p12 = scmp.lt.u32.totalorder %s1884_s6, %s2320_s3 }
 0x1ed   : > { %p1886_p10 = pnand %p1885_p5, %p1548_p6 }
 0x1ef   : > { %p1887_p11 = pneg %p1886_p10 }
 0x1f1   : > { %p1892_p8 = pnand %p1890_p12, %p1887_p11 }
 0x1f3   : > { %1895 = shalt.err (!%p1892_p8)
}
 0x1f4   : > { %s1948_s15 = smov 512   ;;  %s1949_s27 = smov 32  }
 0x1f5   : > { %1531 = dma.vmem_to_hbm [thread:$0]  (%p1548_p6), %s1272_s7, 1024, %s2320_s3, [#allocation5], %s1948_s15, %s1948_s15, %s1949_s27  }
 0x1f6   : > { %1921 = dma.done.wait (%p1548_p6), [#allocation5], 1024  }
 0x1f7   : > { %1923 = vsyncadd (%p1548_p6), [#allocation5], 4294966272 }
 0x1f8 PF: > { %p15_p13 = scmp.ge.s32.totalorder %s1991_s16, 10   ;;  %s2339_s12 = smov %s1930_s13 }
 0x1f9   : > { %s2340_s13 = smov %s1934_s14  ;;  %s2341_s14 = smov %s2001_s19 }
 0x1fa   : > { %s2342_s15 = smov %s1991_s16  ;;  %17 = sbr.rel (!%p15_p13) target bundleno = 5 (0x5), region = 93 }
 0x201   :  { %1287 = vsyncpa [#allocation4], 1 }
 0x202   :  { %1289 = vsyncpa [#allocation4 + $0x1], 1 }
 0x203   :  { %1290 = vsyncpa [#allocation7], 1 }
 0x204   :  { %1292 = vsyncpa [#allocation7 + $0x1], 1 }
 0x205   :  { %1293 = vsyncpa [#allocation5], 1 }
 0x206   :  { %1295 = vsyncpa [#allocation5 + $0x1], 1 }

</bundles_post_ra>
